<compile_context>
chip_gen: v6e
topology: v6e:2x2x1
jax: 0.10.0
libtpu: 0.0.40
codegen_flags: <defaults>
</compile_context>

<pallas_src>
import functools
import math

import jax
import jax.numpy as jnp
from jax.experimental import pallas as pl
from jax.experimental.pallas import tpu as pltpu


# ----------------------------- Pallas kernel --------------------------------

def _longrope_kernel(pos_ref, inv_freq_ref, cos_ref, sin_ref, *, scaling_factor):
    # pos_ref:      (1, tile_s, 1)   int32  (position ids, column layout)
    # inv_freq_ref: (1, dim)         f32    (inv_freq duplicated across halves)
    # cos_ref/sin_ref: (1, tile_s, dim) out dtype
    pos = pos_ref[0].astype(jnp.float32)          # (tile_s, 1)
    inv_freq = inv_freq_ref[...]                  # (1, dim)
    emb = pos * inv_freq                          # (tile_s, dim), fp32 outer product
    cos_ref[0] = (jnp.cos(emb) * scaling_factor).astype(cos_ref.dtype)
    sin_ref[0] = (jnp.sin(emb) * scaling_factor).astype(sin_ref.dtype)


def _pick_tile_s(S):
    for cand in (1024, 512, 256, 128, 64, 32, 16, 8):
        if S % cand == 0:
            return cand
    return S  # fall back to full sequence in one block


def longrope_cos_sin_pallas(position_ids, inv_freq_full, *, scaling_factor,
                            out_dtype, tile_s=None):
    """position_ids: (B, S) int; inv_freq_full: (dim,) f32 (halves duplicated)."""
    B, S = position_ids.shape
    dim = inv_freq_full.shape[0]
    if tile_s is None:
        tile_s = _pick_tile_s(S)
    assert S % tile_s == 0
    grid = (B, S // tile_s)

    pos3 = position_ids.astype(jnp.int32).reshape(B, S, 1)
    invf = inv_freq_full.astype(jnp.float32).reshape(1, dim)

    kernel = functools.partial(_longrope_kernel, scaling_factor=scaling_factor)
    cos, sin = pl.pallas_call(
        kernel,
        out_shape=(jax.ShapeDtypeStruct((B, S, dim), out_dtype),
                   jax.ShapeDtypeStruct((B, S, dim), out_dtype)),
        grid=grid,
        in_specs=[
            pl.BlockSpec((1, tile_s, 1), lambda b, s: (b, s, 0)),
            pl.BlockSpec((1, dim), lambda b, s: (0, 0)),
        ],
        out_specs=[
            pl.BlockSpec((1, tile_s, dim), lambda b, s: (b, s, 0)),
            pl.BlockSpec((1, tile_s, dim), lambda b, s: (b, s, 0)),
        ],
        compiler_params=pltpu.CompilerParams(
            dimension_semantics=("parallel", "parallel")),
    )(pos3, invf)
    return cos, sin


# ------------------------------- JAX wrapper ---------------------------------

def phi3_longrope_forward(x, position_ids, *, dim, max_position_embeddings,
                          original_max_position_embeddings, rope_theta,
                          short_factor, long_factor):
    """Mirrors Phi3LongRoPEScaledRotaryEmbedding.forward -> (cos, sin)."""
    # TODO(synk): data-dependent long/short factor selection (max over the
    # whole position_ids tensor) is a tiny reduction + (dim/2,) select kept in
    # plain JAX rather than the kernel.
    seq_len = jnp.max(position_ids) + 1
    short = jnp.asarray(short_factor, dtype=jnp.float32)
    long = jnp.asarray(long_factor, dtype=jnp.float32)
    ext_factors = jnp.where(seq_len > original_max_position_embeddings, long, short)

    exponents = jnp.arange(0, dim, 2, dtype=jnp.float32) / dim       # (dim/2,)
    inv_freq = 1.0 / (ext_factors * (rope_theta ** exponents))        # (dim/2,)
    inv_freq_full = jnp.concatenate([inv_freq, inv_freq], axis=0)     # (dim,)

    scale = max_position_embeddings / original_max_position_embeddings
    if scale <= 1.0:
        scaling_factor = 1.0
    else:
        scaling_factor = math.sqrt(
            1.0 + math.log(scale) / math.log(original_max_position_embeddings))

    return longrope_cos_sin_pallas(position_ids, inv_freq_full,
                                   scaling_factor=scaling_factor,
                                   out_dtype=x.dtype)


# -------------------------------- reference ----------------------------------

def _reference(x, position_ids, *, dim, max_position_embeddings,
               original_max_position_embeddings, rope_theta,
               short_factor, long_factor):
    seq_len = jnp.max(position_ids) + 1
    ext = jnp.where(seq_len > original_max_position_embeddings,
                    jnp.asarray(long_factor, jnp.float32),
                    jnp.asarray(short_factor, jnp.float32))
    inv_freq = 1.0 / (ext * rope_theta ** (
        jnp.arange(0, dim, 2, dtype=jnp.float32) / dim))
    # (B, dim/2, 1) @ (B, 1, S) -> (B, dim/2, S) -> transpose -> (B, S, dim/2)
    freqs = jnp.einsum("bd,bs->bsd",
                       jnp.broadcast_to(inv_freq, (position_ids.shape[0], dim // 2)),
                       position_ids.astype(jnp.float32))
    emb = jnp.concatenate([freqs, freqs], axis=-1)
    scale = max_position_embeddings / original_max_position_embeddings
    if scale <= 1.0:
        scaling_factor = 1.0
    else:
        scaling_factor = math.sqrt(
            1.0 + math.log(scale) / math.log(original_max_position_embeddings))
    cos = (jnp.cos(emb) * scaling_factor).astype(x.dtype)
    sin = (jnp.sin(emb) * scaling_factor).astype(x.dtype)
    return cos, sin


# ----------------------------------- main -------------------------------------

if __name__ == "__main__":
    # Small Phi3-like config.
    B, S, dim = 2, 64, 32
    max_position_embeddings = 512
    original_max_position_embeddings = 128
    rope_theta = 10000.0

    key = jax.random.PRNGKey(0)
    kx, ks, kl = jax.random.split(key, 3)
    x = jax.random.normal(kx, (B, S, dim), dtype=jnp.float32)
    short_factor = 1.0 + 0.2 * jax.random.uniform(ks, (dim // 2,), dtype=jnp.float32)
    long_factor = 2.0 + jax.random.uniform(kl, (dim // 2,), dtype=jnp.float32)

    cfg = dict(dim=dim,
               max_position_embeddings=max_position_embeddings,
               original_max_position_embeddings=original_max_position_embeddings,
               rope_theta=rope_theta,
               short_factor=short_factor,
               long_factor=long_factor)

    # Short-factor path: max(position_ids)+1 = 64 <= 128.
    pos_short = jnp.broadcast_to(jnp.arange(S, dtype=jnp.int32), (B, S))
    cos_s, sin_s = phi3_longrope_forward(x, pos_short, **cfg)
    cos_s, sin_s = jax.block_until_ready((cos_s, sin_s))
    rcos_s, rsin_s = _reference(x, pos_short, **cfg)
    assert cos_s.shape == (B, S, dim) and sin_s.shape == (B, S, dim)
    assert jnp.allclose(cos_s, rcos_s, atol=5e-3, rtol=5e-3), "cos mismatch (short)"
    assert jnp.allclose(sin_s, rsin_s, atol=5e-3, rtol=5e-3), "sin mismatch (short)"

    # Long-factor path: max(position_ids)+1 = 164 > 128.
    pos_long = pos_short + 100
    cos_l, sin_l = phi3_longrope_forward(x, pos_long, **cfg)
    cos_l, sin_l = jax.block_until_ready((cos_l, sin_l))
    rcos_l, rsin_l = _reference(x, pos_long, **cfg)
    assert jnp.allclose(cos_l, rcos_l, atol=5e-3, rtol=5e-3), "cos mismatch (long)"
    assert jnp.allclose(sin_l, rsin_l, atol=5e-3, rtol=5e-3), "sin mismatch (long)"

    print("KERNEL_OK")
</pallas_src>

<mosaic_0001>
module attributes {stable_mosaic.version = 11 : i64} {
  func.func @_longrope_kernel(%arg0: i32, %arg1: i32, %arg2: memref<1x64x1xi32, #tpu.memory_space<vmem>>, %arg3: memref<1x32xf32, #tpu.memory_space<vmem>>, %arg4: memref<1x64x32xf32, #tpu.memory_space<vmem>>, %arg5: memref<1x64x32xf32, #tpu.memory_space<vmem>>) attributes {dimension_semantics = [#tpu.dimension_semantics<parallel>, #tpu.dimension_semantics<parallel>], iteration_bounds = array<i64: 2, 1>, scalar_prefetch = 0 : i64, scratch_operands = 0 : i64, tpu.core_type = #tpu.core_type<tc>, window_params = [{transform_indices = @transform_0, window_bounds = array<i64: 1, 64, 1>}, {pipeline_mode = #tpu.pipeline_mode<synchronous>, transform_indices = @transform_1, window_bounds = array<i64: 1, 32>}, {transform_indices = @transform_2, window_bounds = array<i64: 1, 64, 32>}, {transform_indices = @transform_3, window_bounds = array<i64: 1, 64, 32>}]} {
    %c0 = arith.constant 0 : index
    %c0_0 = arith.constant 0 : index
    %c0_1 = arith.constant 0 : index
    %0 = vector.load %arg2[%c0, %c0_0, %c0_1] : memref<1x64x1xi32, #tpu.memory_space<vmem>>, vector<1x64x1xi32>
    %1 = vector.shape_cast %0 : vector<1x64x1xi32> to vector<64x1xi32>
    %2 = arith.sitofp %1 : vector<64x1xi32> to vector<64x1xf32>
    %c0_2 = arith.constant 0 : index
    %c0_3 = arith.constant 0 : index
    %3 = vector.load %arg3[%c0_2, %c0_3] : memref<1x32xf32, #tpu.memory_space<vmem>>, vector<1x32xf32>
    %4 = vector.broadcast %2 : vector<64x1xf32> to vector<64x32xf32>
    %5 = vector.broadcast %3 : vector<1x32xf32> to vector<64x32xf32>
    %6 = arith.mulf %4, %5 : vector<64x32xf32>
    %7 = math.cos %6 : vector<64x32xf32>
    %cst = arith.constant 1.13389337 : f32
    %8 = vector.broadcast %cst : f32 to vector<64x32xf32>
    %9 = arith.mulf %7, %8 : vector<64x32xf32>
    %c0_4 = arith.constant 0 : index
    %c0_5 = arith.constant 0 : index
    %c0_6 = arith.constant 0 : index
    %10 = vector.load %arg4[%c0_4, %c0_5, %c0_6] : memref<1x64x32xf32, #tpu.memory_space<vmem>>, vector<1x64x32xf32>
    %11 = vector.shape_cast %10 : vector<1x64x32xf32> to vector<64x32xf32>
    %12 = vector.shape_cast %9 : vector<64x32xf32> to vector<1x64x32xf32>
    tpu.vector_store %arg4[%c0_4, %c0_5, %c0_6], %12 {strides = array<i32>} : memref<1x64x32xf32, #tpu.memory_space<vmem>>, vector<1x64x32xf32>,
    %13 = math.sin %6 : vector<64x32xf32>
    %cst_7 = arith.constant 1.13389337 : f32
    %14 = vector.broadcast %cst_7 : f32 to vector<64x32xf32>
    %15 = arith.mulf %13, %14 : vector<64x32xf32>
    %c0_8 = arith.constant 0 : index
    %c0_9 = arith.constant 0 : index
    %c0_10 = arith.constant 0 : index
    %16 = vector.load %arg5[%c0_8, %c0_9, %c0_10] : memref<1x64x32xf32, #tpu.memory_space<vmem>>, vector<1x64x32xf32>
    %17 = vector.shape_cast %16 : vector<1x64x32xf32> to vector<64x32xf32>
    %18 = vector.shape_cast %15 : vector<64x32xf32> to vector<1x64x32xf32>
    tpu.vector_store %arg5[%c0_8, %c0_9, %c0_10], %18 {strides = array<i32>} : memref<1x64x32xf32, #tpu.memory_space<vmem>>, vector<1x64x32xf32>,
    return
  }
  func.func @transform_0(%arg0: i32, %arg1: i32) -> (i32, i32, i32) {
    %c0_i32 = arith.constant 0 : i32
    %c0_i32_0 = arith.constant 0 : i32
    return %arg0, %arg1, %c0_i32 : i32, i32, i32
  }
  func.func @transform_1(%arg0: i32, %arg1: i32) -> (i32, i32) {
    %c0_i32 = arith.constant 0 : i32
    %c0_i32_0 = arith.constant 0 : i32
    %c0_i32_1 = arith.constant 0 : i32
    return %c0_i32, %c0_i32_0 : i32, i32
  }
  func.func @transform_2(%arg0: i32, %arg1: i32) -> (i32, i32, i32) {
    %c0_i32 = arith.constant 0 : i32
    %c0_i32_0 = arith.constant 0 : i32
    return %arg0, %arg1, %c0_i32 : i32, i32, i32
  }
  func.func @transform_3(%arg0: i32, %arg1: i32) -> (i32, i32, i32) {
    %c0_i32 = arith.constant 0 : i32
    %c0_i32_0 = arith.constant 0 : i32
    return %arg0, %arg1, %c0_i32 : i32, i32, i32
  }
}

</mosaic_0001>

<bundles_post_ra>
// kernel: tpu_custom_call.1
= control target key start
LH: loop header
LB: loop body
LE: loop exit
PB: predicated region body
PF: predicated region fallthrough
CT: control target
= control target key end

     0   :  { %s2361_s12 = smov 0   ;;  %s2363_s13 = smov 0   ;;  %s3155_s0 = inlined_call_operand.vmem [shape: s32[2,64,1], index: 0, kind: input, shape index: {}]   ;;  %s3156_s1 = inlined_call_operand.vmem [shape: f32[1,32], index: 1, kind: input, shape index: {}]   ;;  %s3157_s2 = inlined_call_operand.vmem [shape: f32[2,64,32], index: 2, kind: output, shape index: {0}]   ;;  %s3158_s3 = inlined_call_operand.vmem [shape: f32[2,64,32], index: 3, kind: output, shape index: {1}]  }
   0x1   :  { %s2365_s14 = smov 0  }
   0x2 LB: > { %s26_s15 = sadd.s32 1, %s2328_s13  ;;  %p2135_p0 = scmp.ge.s32.totalorder %s2332_s14, 1  ;;  %s2332_s14 = sphi %s2365_s14, %s14_s14   ;;  %s2328_s13 = sphi %s2363_s13, %s3172_s13   ;;  %s2324_s12 = sphi %s2361_s12, %s3171_s12  }
   0x3   : > { %p28_p1 = scmp.ge.s32.totalorder %s26_s15, 2  ;;  %p163_p2 = scmp.lt.s32.totalorder %s2332_s14, 3 }
   0x5   : > { %s3174_s15 = smov (%p28_p1, %s26_s15), 0  ;;  %p164_p3 = pnand %p2135_p0, %p163_p2 }
   0x6   : > { %p205_p4 = scmp.lt.s32.totalorder (!%p164_p3), %s2324_s12, 1 }
   0x7   : > { %167 = sbr.rel (%p164_p3) target bundleno = 398 (0x18e), region = 28 }
   0xc   : > { %v2334_v0 = vmov 0   ;;  %s3176_s12 = smov (!%p205_p4, %s2324_s12), 1  ;;  %v2388_v17 = vld [vmem:[%s3156_s1] ss:$0 sm:$0xff]  ;;  %v2335_v52 = vmov 683565275  }
   0xd   : > { %2276 = vset.pattern.permute.xlu1 %v2334_v0  ;;  %2275 = vset.pattern.permute.xlu0 %v2334_v0  ;;  %s2379_s16 = sshll.u32 %s3176_s12, 6  ;;  %v2336_v56 = vmov 2475754826   ;;  %v2337_v58 = vmov 2131351028  }
   0xe   : > { %s212_s19 = scalar_lea.vmem %s3155_s0, %s2379_s16  ;;  %v2338_v60 = vmov 2102212464   ;;  %v2339_v62 = vmov 920167782   ;;  %s2694_s24 = scalar_lea.vmem %s3157_s2, %s2379_s16 }
   0xf   : > { %v236_v1 = vld [vmem:[%s212_s19 + $0x10] sm:$0xff]  ;;  %v234_v2 = vld [vmem:[%s212_s19] sm:$0xff]  ;;  %v237_v3 = vld [vmem:[%s212_s19 + $0x18] sm:$0xff]  ;;  %s2700_s27 = scalar_lea.vmem %s3158_s3, %s2379_s16 }
  0x10   : > { %v244_v4 = vcvt.s32.f32 %v236_v1  ;;  %v242_v5 = vcvt.s32.f32 %v234_v2  ;;  %v235_v6 = vld [vmem:[%s212_s19 + $0x8] sm:$0xff]  ;;  %v245_v7 = vcvt.s32.f32 %v237_v3  ;;  %v238_v10 = vld [vmem:[%s212_s19 + $0x20] sm:$0xff]  ;;  %v241_v13 = vld [vmem:[%s212_s19 + $0x38] sm:$0xff] }
  0x11   : > { %v243_v8 = vcvt.s32.f32 %v235_v6  ;;  %v239_v9 = vld [vmem:[%s212_s19 + $0x28] sm:$0xff]  ;;  %v246_v12 = vcvt.s32.f32 %v238_v10  ;;  %v240_v14 = vld [vmem:[%s212_s19 + $0x30] sm:$0xff]  ;;  %v249_v15 = vcvt.s32.f32 %v241_v13 }
  0x12   : > { %263 = vperm.xlu1 %2276, %v244_v4   ;;  %253 = vperm.xlu0 %2275, %v242_v5   ;;  %v247_v11 = vcvt.s32.f32 %v239_v9  ;;  %v248_v16 = vcvt.s32.f32 %v240_v14  ;;  %v2340_v5 = vmov 1326507024  }
  0x16   : > { %268 = vperm.xlu1 %2276, %v245_v7   ;;  %258 = vperm.xlu0 %2275, %v243_v8  }
  0x1a   : > { %278 = vperm.xlu1 %2276, %v247_v11   ;;  %273 = vperm.xlu0 %2275, %v246_v12  }
  0x1e   : > { %288 = vperm.xlu1 %2276, %v249_v15   ;;  %283 = vperm.xlu0 %2275, %v248_v16  }
  0x8d   : > { %v264_v18 = vpop.permute.xlu1 %263  ;;  %v254_v19 = vpop.permute.xlu0 %253 }
  0x8e   : > { %v2391_v20 = vmul.f32 %v2388_v17, %v264_v18  ;;  %v2394_v21 = vmul.f32 %v2388_v17, %v254_v19 }
  0x90   : > { %v511_v22 = vand.u32 2147483647, %v2391_v20  ;;  %v514_v23 = vand.u32 2139095040, %v2391_v20  ;;  %v305_v24 = vand.u32 2147483647, %v2394_v21  ;;  %v308_v25 = vand.u32 2139095040, %v2394_v21 }
  0x91   : > { %v269_v26 = vpop.permute.xlu1 %268  ;;  %v259_v40 = vpop.permute.xlu0 %258  ;;  %vm513_vm14 = vcmp.lt.s32.totalorder %v2391_v20, 0 }
  0x92   : > { %v515_v27 = vshrl.u32 %v514_v23, 23  ;;  %v2401_v28 = vmul.f32 %v2388_v17, %v269_v26  ;;  %v518_v29 = vand.u32 8388607, %v511_v22  ;;  %v309_v30 = vshrl.u32 %v308_v25, 23 }
  0x93   : > { %v312_v31 = vand.u32 8388607, %v305_v24  ;;  %v2409_v46 = vmul.f32 %v2388_v17, %v259_v40  ;;  %vm2492_vm13 = vcmp.le.f32.partialorder %v511_v22, 0.7853982 }
  0x94   : > { %v2151_v32 = vadd.s32 4294967169, %v515_v27  ;;  %v2143_v33 = vadd.s32 4294967169, %v309_v30  ;;  %v617_v34 = vand.u32 2139095040, %v2401_v28  ;;  %v519_v36 = vor.u32 8388608, %v518_v29 }
  0x95   : > { %v313_v37 = vor.u32 8388608, %v312_v31  ;;  %v614_v50 = vand.u32 2147483647, %v2401_v28 }
  0x96   : > { %v521_v35 = vadd.s32 1, %v2151_v32  ;;  %v315_v38 = vadd.s32 1, %v2143_v33  ;;  %v618_v39 = vshrl.u32 %v617_v34, 23  ;;  %v2411_v47 = vshll.u32 %v519_v36, 8 }
  0x97   : > { %v2415_v49 = vshll.u32 %v313_v37, 8 }
  0x98   : > { %vm522_vm0 = vcmp.gt.s32.totalorder %v521_v35, 0  ;;  %vm316_vm1 = vcmp.gt.s32.totalorder %v315_v38, 0  ;;  %v2155_v42 = vadd.s32 4294967169, %v618_v39 }
  0x99   : > { %v523_v41 = vsel %vm522_vm0, %v521_v35, 0  ;;  %v317_v45 = vsel %vm316_vm1, %v315_v38, 0  ;;  %vm307_vm0 = vcmp.lt.s32.totalorder %v2394_v21, 0 }
  0x9a   : > { %v524_v43 = vshrl.u32 %v523_v41, 5  ;;  %v525_v44 = vand.u32 31, %v523_v41  ;;  %v2413_v48 = vshrl.u32 %v317_v45, 5  ;;  %v319_v54 = vand.u32 31, %v317_v45 }
  0x9b   : > { %v2419_v55 = vadd.s32 1, %v2155_v42 }
  0x9c   : > { %v526_v51 = vsub.s32 32, %v525_v44  ;;  %v528_v53 = vshll.u32 %v2335_v52, %v525_v44  ;;  %v531_v57 = vshll.u32 %v2336_v56, %v525_v44  ;;  %v534_v59 = vshll.u32 %v2337_v58, %v525_v44 }
  0x9d   : > { %v537_v61 = vshll.u32 %v2338_v60, %v525_v44  ;;  %v540_v63 = vshll.u32 %v2339_v62, %v525_v44  ;;  %vm543_vm2 = vcmp.lt.s32.totalorder %v524_v43, 1  ;;  %vm544_vm3 = vcmp.lt.s32.totalorder %v524_v43, 2 }
  0x9e   : > { %v529_v0 = vshrl.u32 %v2336_v56, %v526_v51  ;;  %v532_v1 = vshrl.u32 %v2337_v58, %v526_v51  ;;  %v535_v2 = vshrl.u32 %v2338_v60, %v526_v51  ;;  %v527_v3 = vshrl.u32 %v2335_v52, %v526_v51 }
  0x9f   : > { %v538_v4 = vshrl.u32 %v2339_v62, %v526_v51  ;;  %v541_v6 = vshrl.u32 %v2340_v5, %v526_v51  ;;  %v320_v10 = vsub.s32 32, %v319_v54  ;;  %vm545_vm4 = vcmp.lt.s32.totalorder %v524_v43, 3 }
  0xa0   : > { %v530_v7 = vor.u32 %v529_v0, %v528_v53  ;;  %v533_v8 = vor.u32 %v532_v1, %v531_v57  ;;  %v536_v9 = vor.u32 %v535_v2, %v534_v59  ;;  %vm546_vm5 = vcmp.lt.s32.totalorder %v524_v43, 4 }
  0xa1   : > { %v539_v11 = vor.u32 %v538_v4, %v537_v61  ;;  %v542_v12 = vor.u32 %v541_v6, %v540_v63  ;;  %v322_v25 = vshll.u32 %v2335_v52, %v319_v54  ;;  %v323_v29 = vshrl.u32 %v2336_v56, %v320_v10 }
  0xa2   : > { %v547_v13 = vsel %vm543_vm2, %v527_v3, %v530_v7  ;;  %v548_v14 = vsel %vm546_vm5, %v536_v9, 2102212464  ;;  %v551_v15 = vsel %vm543_vm2, %v530_v7, %v533_v8  ;;  %v555_v16 = vsel %vm543_vm2, %v533_v8, %v536_v9 }
  0xa3   : > { %v549_v18 = vsel %vm545_vm4, %v533_v8, %v548_v14  ;;  %v552_v19 = vsel %vm546_vm5, %v539_v11, 920167782  ;;  %v556_v23 = vsel %vm546_vm5, %v542_v12, 1326507024  ;;  %v325_v30 = vshll.u32 %v2336_v56, %v319_v54 }
  0xa4   : > { %v553_v26 = vsel %vm545_vm4, %v536_v9, %v552_v19  ;;  %v557_v27 = vsel %vm545_vm4, %v539_v11, %v556_v23  ;;  %v550_v31 = vsel %vm544_vm3, %v547_v13, %v549_v18  ;;  %v326_v34 = vshrl.u32 %v2337_v58, %v320_v10 }
  0xa5   : > { %v554_v32 = vsel %vm544_vm3, %v551_v15, %v553_v26  ;;  %v558_v33 = vsel %vm544_vm3, %v555_v16, %v557_v27  ;;  %v324_v39 = vor.u32 %v323_v29, %v322_v25  ;;  %v328_v41 = vshll.u32 %v2337_v58, %v319_v54 }
  0xa6   : > { %v2442_v35 = vmul.u32.u64.low %v2411_v47, %v558_v33  ;;  %v2443_v36 = vmul.u32.u64.high %v2411_v47, %v558_v33, %v2442_v35  ;;  %v2446_v37 = vmul.u32.u64.low %v2411_v47, %v554_v32  ;;  %v2447_v38 = vmul.u32.u64.high %v2411_v47, %v554_v32, %v2446_v37 }
  0xa7   : > { %v327_v40 = vor.u32 %v326_v34, %v325_v30  ;;  %v329_v42 = vshrl.u32 %v2338_v60, %v320_v10  ;;  %v321_v43 = vshrl.u32 %v2335_v52, %v320_v10  ;;  %v331_v44 = vshll.u32 %v2338_v60, %v319_v54 }
  0xa8   : > { %v332_v45 = vshrl.u32 %v2339_v62, %v320_v10  ;;  %v335_v51 = vshrl.u32 %v2340_v5, %v320_v10  ;;  %v566_v53 = vmul.u32 %v2411_v47, %v550_v31  ;;  %v334_v59 = vshll.u32 %v2339_v62, %v319_v54 }
  0xa9   : > { %v330_v57 = vor.u32 %v329_v42, %v328_v41  ;;  %vm337_vm6 = vcmp.lt.s32.totalorder %v2413_v48, 1  ;;  %vm568_vm7 = vc.u32 %v2443_v36, %v2446_v37  ;;  %v569_v61 = vadd.s32 1, %v2447_v38 }
  0xaa   : > { %v333_v63 = vor.u32 %v332_v45, %v331_v44  ;;  %vm338_vm8 = vcmp.lt.s32.totalorder %v2413_v48, 2  ;;  %v336_v0 = vor.u32 %v335_v51, %v334_v59  ;;  %vm339_vm9 = vcmp.lt.s32.totalorder %v2413_v48, 3 }
  0xab   : > { %vm340_vm10 = vcmp.lt.s32.totalorder %v2413_v48, 4  ;;  %v345_v1 = vsel %vm337_vm6, %v324_v39, %v327_v40  ;;  %v570_v47 = vsel %vm568_vm7, %v569_v61, %v2447_v38  ;;  %v349_v3 = vsel %vm337_vm6, %v327_v40, %v330_v57 }
  0xac   : > { %v342_v2 = vsel %vm340_vm10, %v330_v57, 2102212464  ;;  %v346_v54 = vsel %vm340_vm10, %v333_v63, 920167782  ;;  %v571_v4 = vadd.s32 %v570_v47, %v566_v53  ;;  %v341_v6 = vsel %vm337_vm6, %v321_v43, %v324_v39 }
  0xad   : > { %v347_v7 = vsel %vm339_vm9, %v330_v57, %v346_v54  ;;  %v350_v8 = vsel %vm340_vm10, %v336_v0, 1326507024  ;;  %v343_v9 = vsel %vm339_vm9, %v327_v40, %v342_v2  ;;  %vm625_vm11 = vcmp.gt.s32.totalorder %v2419_v55, 0 }
  0xae   : > { %v348_v10 = vsel %vm338_vm8, %v345_v1, %v347_v7  ;;  %v351_v11 = vsel %vm339_vm9, %v333_v63, %v350_v8  ;;  %v572_v12 = vadd.s32 536870912, %v571_v4  ;;  %v344_v23 = vsel %vm338_vm8, %v341_v6, %v343_v9 }
  0xaf   : > { %v352_v13 = vsel %vm338_vm8, %v349_v3, %v351_v11  ;;  %v2472_v14 = vmul.u32.u64.low %v2415_v49, %v348_v10  ;;  %v2473_v15 = vmul.u32.u64.high %v2415_v49, %v348_v10, %v2472_v14  ;;  %v621_v25 = vand.u32 8388607, %v614_v50 }
  0xb0   : > { %v2476_v16 = vmul.u32.u64.low %v2415_v49, %v352_v13  ;;  %v2477_v18 = vmul.u32.u64.high %v2415_v49, %v352_v13, %v2476_v16  ;;  %v573_v19 = vshrl.u32 %v572_v12, 30  ;;  %v626_v26 = vsel %vm625_vm11, %v2419_v55, 0 }
  0xb1   : > { %v363_v29 = vadd.s32 1, %v2473_v15  ;;  %v411_v30 = vand.u32 2139095040, %v2409_v46  ;;  %v360_v31 = vmul.u32 %v2415_v49, %v344_v23  ;;  %v628_v34 = vand.u32 31, %v626_v26 }
  0xb2   : > { %v574_v27 = vshll.u32 %v573_v19, 30  ;;  %vm362_vm12 = vc.u32 %v2477_v18, %v2472_v14  ;;  %v622_v35 = vor.u32 8388608, %v621_v25  ;;  %v408_v55 = vand.u32 2147483647, %v2409_v46 }
  0xb3   : > { %v364_v33 = vsel %vm362_vm12, %v363_v29, %v2473_v15  ;;  %v412_v39 = vshrl.u32 %v411_v30, 23  ;;  %v597_v42 = vsub.s32 4, %v573_v19  ;;  %v629_v43 = vsub.s32 32, %v628_v34 }
  0xb4   : > { %v575_v32 = vsub.s32 %v571_v4, %v574_v27  ;;  %v365_v48 = vadd.s32 %v364_v33, %v360_v31  ;;  %v2499_v45 = vshll.u32 %v622_v35, 8  ;;  %v567_v51 = vadd.s32 %v2446_v37, %v2443_v36 }
  0xb5   : > { %v2503_v57 = vshrl.u32 %v626_v26, 5  ;;  %v2505_v59 = vadd.s32 4294967169, %v412_v39  ;;  %v2508_v61 = vadd.s32 %v2472_v14, %v2477_v18  ;;  %v631_v63 = vshll.u32 %v2335_v52, %v628_v34 }
  0xb6   : > { %v577_v38 = vsub.s32 0, %v575_v32  ;;  %v366_v40 = vadd.s32 536870912, %v365_v48  ;;  %v2514_v0 = vand.u32 8388607, %v408_v55  ;;  %v598_v36 = vsel %vm513_vm14, %v597_v42, %v573_v19 }
  0xb7   : > { %v634_v37 = vshll.u32 %v2336_v56, %v628_v34  ;;  %v641_v47 = vshrl.u32 %v2339_v62, %v629_v43  ;;  %v632_v54 = vshrl.u32 %v2336_v56, %v629_v43  ;;  %v635_v3 = vshrl.u32 %v2337_v58, %v629_v43 }
  0xb8   : > { %v2152_v41 = vmin.u32 %v577_v38, %v575_v32  ;;  %v2497_v44 = vshrl.u32 %v366_v40, 30  ;;  %v638_v4 = vshrl.u32 %v2338_v60, %v629_v43  ;;  %v630_v6 = vshrl.u32 %v2335_v52, %v629_v43 }
  0xb9   : > { %v640_v7 = vshll.u32 %v2338_v60, %v628_v34  ;;  %v644_v8 = vshrl.u32 %v2340_v5, %v629_v43  ;;  %v2530_v10 = vsel %vm2492_vm13, 0, %v598_v36  ;;  %v637_v12 = vshll.u32 %v2337_v58, %v628_v34 }
  0xba   : > { %v579_v53 = vclz %v2152_v41  ;;  %v368_v22 = vshll.u32 %v2497_v44, 30  ;;  %v643_v16 = vshll.u32 %v2339_v62, %v628_v34  ;;  %v633_v19 = vor.u32 %v632_v54, %v631_v63 }
  0xbb   : > { %v642_v15 = vor.u32 %v641_v47, %v640_v7  ;;  %v636_v23 = vor.u32 %v635_v3, %v634_v37  ;;  %v639_v25 = vor.u32 %v638_v4, %v637_v12  ;;  %v391_v33 = vsub.s32 4, %v2497_v44 }
  0xbc   : > { %v2153_v1 = vadd.s32 4294967294, %v579_v53  ;;  %v2520_v2 = vsub.s32 %v365_v48, %v368_v22  ;;  %v645_v30 = vor.u32 %v644_v8, %v643_v16  ;;  %vm646_vm1 = vcmp.lt.s32.totalorder %v2503_v57, 1 }
  0xbd   : > { %vm649_vm2 = vcmp.lt.s32.totalorder %v2503_v57, 4  ;;  %vm647_vm3 = vcmp.lt.s32.totalorder %v2503_v57, 2  ;;  %vm648_vm4 = vcmp.lt.s32.totalorder %v2503_v57, 3  ;;  %v658_v39 = vsel %vm646_vm1, %v636_v23, %v639_v25 }
  0xbe   : > { %vm2154_vm15 = vcmp.lt.s32.totalorder %v2153_v1, 0  ;;  %v371_v11 = vsub.s32 0, %v2520_v2  ;;  %v655_v35 = vsel %vm649_vm2, %v642_v15, 920167782  ;;  %vm2548_vm5 = vcmp.le.f32.partialorder %v305_v24, 0.7853982 }
  0xbf   : > { %v582_v9 = vsel %vm2154_vm15, 0, %v2153_v1  ;;  %v651_v42 = vsel %vm649_vm2, %v639_v25, 2102212464  ;;  %v656_v43 = vsel %vm648_vm4, %v639_v25, %v655_v35  ;;  %v650_v22 = vsel %vm646_vm1, %v630_v6, %v633_v19 }
  0xc0   : > { %v583_v13 = vsub.s32 32, %v582_v9  ;;  %v587_v14 = vsub.s32 4294967266, %v582_v9  ;;  %v2144_v18 = vmin.u32 %v371_v11, %v2520_v2  ;;  %v584_v26 = vshll.u32 %v575_v32, %v582_v9 }
  0xc1   : > { %v654_v32 = vsel %vm646_vm1, %v633_v19, %v636_v23  ;;  %v652_v3 = vsel %vm648_vm4, %v636_v23, %v651_v42  ;;  %v418_v4 = vadd.s32 1, %v2505_v59  ;;  %v392_v59 = vsel %vm307_vm0, %v391_v33, %v2497_v44 }
  0xc2   : > { %v585_v27 = vshrl.u32 %v567_v51, %v583_v13  ;;  %v588_v29 = vadd.s32 127, %v587_v14  ;;  %v373_v31 = vclz %v2144_v18  ;;  %v659_v51 = vsel %vm649_vm2, %v645_v30, 1326507024 }
  0xc3   : > { %v660_v63 = vsel %vm648_vm4, %v642_v15, %v659_v51  ;;  %v657_v24 = vsel %vm647_vm3, %v654_v32, %v656_v43  ;;  %v279_v15 = vpop.permute.xlu1 %278  ;;  %v1447_v18 = vadd.s32 3, %v2530_v10  ;;  %vm419_vm7 = vcmp.gt.s32.totalorder %v418_v4, 0 }
  0xc4   : > { %v586_v48 = vor.u32 %v585_v27, %v584_v26  ;;  %v589_v34 = vshll.u32 %v588_v29, 23  ;;  %v2145_v38 = vadd.s32 4294967294, %v373_v31  ;;  %v661_v37 = vsel %vm647_vm3, %v658_v39, %v660_v63 }
  0xc5   : > { %v2567_v8 = vmul.u32.u64.low %v2499_v45, %v661_v37  ;;  %v2568_v9 = vmul.u32.u64.high %v2499_v45, %v661_v37, %v2567_v8  ;;  %v2572_v13 = vmul.u32.u64.low %v2499_v45, %v657_v24  ;;  %v2573_v14 = vmul.u32.u64.high %v2499_v45, %v657_v24, %v2572_v13 }
  0xc6   : > { %v590_v40 = vor.u32 4788187, %v589_v34  ;;  %v593_v53 = vcvt.s32.f32 %v586_v48  ;;  %vm2146_vm6 = vcmp.lt.s32.totalorder %v2145_v38, 0  ;;  %v420_v23 = vsel %vm419_vm7, %v418_v4, 0 }
  0xc7   : > { %v376_v36 = vsel %vm2146_vm6, 0, %v2145_v38  ;;  %v2585_v26 = vand.u32 3, %v2530_v10  ;;  %vm671_vm8 = vc.u32 %v2568_v9, %v2572_v13  ;;  %v2590_v27 = vmul.f32 %v2388_v17, %v279_v15 }
  0xc8   : > { %v591_v1 = vand.u32 2147483647, %v590_v40  ;;  %v377_v47 = vsub.s32 32, %v376_v36  ;;  %v381_v54 = vsub.s32 4294967266, %v376_v36  ;;  %v378_v6 = vshll.u32 %v2520_v2, %v376_v36 }
  0xc9   : > { %v394_v57 = vsel %vm2548_vm5, 0, %v392_v59  ;;  %v672_v30 = vadd.s32 1, %v2573_v14  ;;  %v2598_v31 = vand.u32 3, %v1447_v18  ;;  %v422_v33 = vand.u32 31, %v420_v23 }
  0xca   : > { %v594_v7 = vmul.f32 %v593_v53, %v591_v1  ;;  %v379_v11 = vshrl.u32 %v2508_v61, %v377_v47  ;;  %v382_v12 = vadd.s32 127, %v381_v54  ;;  %v653_v61 = vsel %vm647_vm3, %v650_v22, %v652_v3 }
  0xcb   : > { %v669_v10 = vmul.u32 %v2499_v45, %v653_v61  ;;  %v673_v35 = vsel %vm671_vm8, %v672_v30, %v2573_v14  ;;  %v1239_v38 = vadd.s32 3, %v394_v57  ;;  %v2602_v32 = vshrl.u32 %v420_v23, 5 }
  0xcc   : > { %v595_v16 = vxor.u32 2147483648, %v594_v7  ;;  %v380_v2 = vor.u32 %v379_v11, %v378_v6  ;;  %v383_v19 = vshll.u32 %v382_v12, 23  ;;  %v423_v39 = vsub.s32 32, %v422_v33 }
  0xcd   : > { %v674_v49 = vadd.s32 %v673_v35, %v669_v10  ;;  %v425_v42 = vshll.u32 %v2335_v52, %v422_v33  ;;  %v428_v43 = vshll.u32 %v2336_v56, %v422_v33  ;;  %v431_v51 = vshll.u32 %v2337_v58, %v422_v33 }
  0xce   : > { %v596_v25 = vsel %vm513_vm14, %v595_v16, %v594_v7  ;;  %v384_v29 = vor.u32 4788187, %v383_v19  ;;  %v387_v34 = vcvt.s32.f32 %v380_v2  ;;  %v426_v45 = vshrl.u32 %v2336_v56, %v423_v39 }
  0xcf   : > { %v599_v44 = vsel %vm2492_vm13, %v2391_v20, %v596_v25  ;;  %v675_v53 = vadd.s32 536870912, %v674_v49  ;;  %v429_v22 = vshrl.u32 %v2337_v58, %v423_v39  ;;  %v434_v63 = vshll.u32 %v2338_v60, %v422_v33 }
  0xd0   : > { %2277 = vcosq.f32 %v599_v44  ;;  %v385_v48 = vand.u32 2147483647, %v384_v29  ;;  %v432_v36 = vshrl.u32 %v2338_v60, %v423_v39  ;;  %v435_v24 = vshrl.u32 %v2339_v62, %v423_v39 }
  0xd1   : > { %2279 = vsinq.f32 %v599_v44  ;;  %v438_v37 = vshrl.u32 %v2340_v5, %v423_v39  ;;  %v2613_v47 = vshrl.u32 %v675_v53, 30  ;;  %v416_v54 = vor.u32 8388608, %v2514_v0 }
  0xd2   : > { %v388_v40 = vmul.f32 %v387_v34, %v385_v48  ;;  %v427_v3 = vor.u32 %v426_v45, %v425_v42  ;;  %v430_v4 = vor.u32 %v429_v22, %v428_v43  ;;  %vm609_vm9 = vcmp.eq.s32.totalorder %v2585_v26, 2 }
  0xd3   : > { %v433_v6 = vor.u32 %v432_v36, %v431_v51  ;;  %v436_v8 = vor.u32 %v435_v24, %v434_v63  ;;  %v437_v11 = vshll.u32 %v2339_v62, %v422_v33  ;;  %vm606_vm10 = vcmp.eq.s32.totalorder %v2585_v26, 0 }
  0xd4   : > { %v389_v1 = vxor.u32 2147483648, %v388_v40  ;;  %v677_v14 = vshll.u32 %v2613_v47, 30  ;;  %vm440_vm11 = vcmp.lt.s32.totalorder %v2602_v32, 1  ;;  %vm443_vm12 = vcmp.lt.s32.totalorder %v2602_v32, 4 }
  0xd5   : > { %vm605_vm13 = vcmp.lt.s32.totalorder %v2585_v26, 2  ;;  %vm1449_vm14 = vcmp.lt.s32.totalorder %v2598_v31, 2  ;;  %v439_v0 = vor.u32 %v438_v37, %v437_v11  ;;  %v448_v15 = vsel %vm440_vm11, %v427_v3, %v430_v4 }
  0xd6   : > { %v390_v7 = vsel %vm307_vm0, %v389_v1, %v388_v40  ;;  %v449_v16 = vsel %vm443_vm12, %v436_v8, 920167782  ;;  %vm603_vm15 = vweird.f32 %v2391_v20  ;;  %v2634_v41 = vand.u32 3, %v394_v57 }
  0xd7   : > { %v393_v12 = vsel %vm2548_vm5, %v2394_v21, %v390_v7  ;;  %v2636_v18 = vsub.s32 %v674_v49, %v677_v14  ;;  %vm442_vm0 = vcmp.lt.s32.totalorder %v2602_v32, 3  ;;  %vm1137_vm1 = vcmask 261120  }
  0xd8   : > { %2281 = vcosq.f32 %v393_v12  ;;  %v2639_v59 = vand.u32 3, %v1239_v38  ;;  %vm441_vm2 = vcmp.lt.s32.totalorder %v2602_v32, 2  ;;  %v450_v2 = vsel %vm442_vm0, %v433_v6, %v449_v16 }
  0xd9   : > { %2283 = vsinq.f32 %v393_v12  ;;  %v2644_v19 = vshll.u32 %v416_v54, 8  ;;  %v680_v61 = vsub.s32 0, %v2636_v18  ;;  %v424_v23 = vshrl.u32 %v2335_v52, %v423_v39 }
  0xda   : > { %v445_v25 = vsel %vm443_vm12, %v433_v6, 2102212464  ;;  %v451_v44 = vsel %vm441_vm2, %v448_v15, %v450_v2  ;;  %v452_v57 = vsel %vm440_vm11, %v430_v4, %v433_v6  ;;  %v453_v30 = vsel %vm443_vm12, %v439_v0, 1326507024 }
  0xdb   : > { %v2657_v10 = vmul.u32.u64.low %v2644_v19, %v451_v44  ;;  %v2658_v33 = vmul.u32.u64.high %v2644_v19, %v451_v44, %v2657_v10  ;;  %vm1450_vm3 = vcmp.eq.s32.totalorder %v2598_v31, 0  ;;  %vm1453_vm4 = vcmp.eq.s32.totalorder %v2598_v31, 2 }
  0xdc   : > { %v2156_v35 = vmin.u32 %v680_v61, %v2636_v18  ;;  %v444_v49 = vsel %vm440_vm11, %v424_v23, %v427_v3  ;;  %v446_v39 = vsel %vm442_vm0, %v430_v4, %v445_v25  ;;  %v454_v40 = vsel %vm442_vm0, %v436_v8, %v453_v30 }
  0xdd   : > { %v2278_v29 = vpop.eup %2277  ;;  %vm403_vm5 = vcmp.eq.s32.totalorder %v2634_v41, 2  ;;  %vm616_vm6 = vcmp.lt.s32.totalorder %v2401_v28, 0  ;;  %v455_v53 = vsel %vm441_vm2, %v452_v57, %v454_v40  ;;  %vm400_vm7 = vcmp.eq.s32.totalorder %v2634_v41, 0 }
  0xde   : > { %v2280_v48 = vpop.eup %2279  ;;  %v610_v34 = vxor.u32 2147483648, %v2278_v29  ;;  %v682_v51 = vclz %v2156_v35  ;;  %vm1242_vm8 = vcmp.eq.s32.totalorder %v2639_v59, 0  ;;  %v823_v63 = vand.u32 2139095040, %v2590_v27 }
  0xdf   : > { %v607_v38 = vxor.u32 2147483648, %v2280_v48  ;;  %vm399_vm11 = vcmp.lt.s32.totalorder %v2634_v41, 2  ;;  %vm1241_vm12 = vcmp.lt.s32.totalorder %v2639_v59, 2  ;;  %v447_v37 = vsel %vm441_vm2, %v444_v49, %v446_v39 }
  0xe0   : > { %v611_v42 = vsel %vm609_vm9, %v610_v34, %v2280_v48  ;;  %v1455_v43 = vsel %vm1453_vm4, %v610_v34, %v2280_v48  ;;  %vm1245_vm9 = vcmp.eq.s32.totalorder %v2639_v59, 2  ;;  %v2157_v24 = vadd.s32 4294967294, %v682_v51 }
  0xe1   : > { %v608_v45 = vsel %vm606_vm10, %v2278_v29, %v607_v38  ;;  %v1452_v22 = vsel %vm1450_vm3, %v2278_v29, %v607_v38  ;;  %vm397_vm10 = vweird.f32 %v2394_v21  ;;  %v466_v6 = vadd.s32 1, %v2658_v33 }
  0xe2   : > { %v612_v1 = vsel %vm605_vm13, %v608_v45, %v611_v42  ;;  %v1456_v36 = vsel %vm1449_vm14, %v1452_v22, %v1455_v43  ;;  %vm2709_vm13 = vcmp.le.f32.partialorder %v614_v50, 0.7853982  ;;  %vm2158_vm14 = vcmp.lt.s32.totalorder %v2157_v24, 0 }
  0xe3   : > { %v613_v26 = vsel %vm603_vm15, nan, %v612_v1  ;;  %v1457_v31 = vsel %vm603_vm15, nan, %v1456_v36  ;;  %v2714_v54 = vmul.u32.u64.low %v2644_v19, %v455_v53  ;;  %v2715_v3 = vmul.u32.u64.high %v2644_v19, %v455_v53, %v2714_v54 }
  0xe4   : > { %v1131_v4 = vmul.f32 1.1338934, %v613_v26  ;;  %v1980_v7 = vmul.f32 1.1338934, %v1457_v31  ;;  %v685_v8 = vsel %vm2158_vm14, 0, %v2157_v24  ;;  %v700_v20 = vsub.s32 4, %v2613_v47 }
  0xe5   : > { %v820_v11 = vand.u32 2147483647, %v2590_v27  ;;  %v824_v12 = vshrl.u32 %v823_v63, 23  ;;  %v2282_v14 = vpop.eup %2281  ;;  %v670_v50 = vadd.s32 %v2572_v13, %v2568_v9  ;;  %v686_v0 = vsub.s32 32, %v685_v8 }
  0xe6   : > { %1140 = vst.msk [vmem:[%s2694_s24 + $0x10] sm:$0xff] %vm1137_vm1, %v1131_v4  ;;  %1988 = vst.msk [vmem:[%s2700_s27 + $0x10] sm:$0xff] %vm1137_vm1, %v1980_v7  ;;  %v690_v15 = vsub.s32 4294967266, %v685_v8  ;;  %v463_v16 = vmul.u32 %v2644_v19, %v447_v37  ;;  %v2284_v2 = vpop.eup %2283  ;;  %v404_v61 = vxor.u32 2147483648, %v2282_v14  ;;  %v687_v23 = vshll.u32 %v2636_v18, %v685_v8  ;;  %v274_v37 = vpop.permute.xlu0 %273 }
  0xe7   : > { %vm465_vm15 = vc.u32 %v2715_v3, %v2657_v10  ;;  %v2163_v25 = vadd.s32 4294967169, %v824_v12  ;;  %v401_v44 = vxor.u32 2147483648, %v2284_v2  ;;  %v688_v29 = vshrl.u32 %v670_v50, %v686_v0 }
  0xe8   : > { %v691_v57 = vadd.s32 127, %v690_v15  ;;  %v467_v30 = vsel %vm465_vm15, %v466_v6, %v2658_v33  ;;  %v405_v9 = vsel %vm403_vm5, %v404_v61, %v2284_v2  ;;  %v1247_v13 = vsel %vm1245_vm9, %v404_v61, %v2284_v2 }
  0xe9   : > { %v701_v19 = vsel %vm616_vm6, %v700_v20, %v2613_v47  ;;  %v468_v18 = vadd.s32 %v467_v30, %v463_v16  ;;  %v402_v48 = vsel %vm400_vm7, %v2282_v14, %v401_v44  ;;  %v1244_v34 = vsel %vm1242_vm8, %v2282_v14, %v401_v44 }
  0xea   : > { %v689_v35 = vor.u32 %v688_v29, %v687_v23  ;;  %v692_v38 = vshll.u32 %v691_v57, 23  ;;  %v406_v33 = vsel %vm399_vm11, %v402_v48, %v405_v9  ;;  %v1248_v49 = vsel %vm1241_vm12, %v1244_v34, %v1247_v13 }
  0xeb   : > { %v469_v39 = vadd.s32 536870912, %v468_v18  ;;  %v830_v40 = vadd.s32 1, %v2163_v25  ;;  %v407_v47 = vsel %vm397_vm10, nan, %v406_v33  ;;  %v1249_v42 = vsel %vm397_vm10, nan, %v1248_v49 }
  0xec   : > { %v693_v43 = vor.u32 4788187, %v692_v38  ;;  %v703_v51 = vsel %vm2709_vm13, 0, %v701_v19  ;;  %v1129_v53 = vmul.f32 1.1338934, %v407_v47  ;;  %v696_v59 = vcvt.s32.f32 %v689_v35 }
  0xed   : > { %v1978_v41 = vmul.f32 1.1338934, %v1249_v42  ;;  %v470_v45 = vshrl.u32 %v469_v39, 30  ;;  %vm831_vm0 = vcmp.gt.s32.totalorder %v830_v40, 0  ;;  %v1551_v1 = vadd.s32 3, %v703_v51 }
  0xee   : > { %v694_v22 = vand.u32 2147483647, %v693_v43  ;;  %v832_v63 = vsel %vm831_vm0, %v830_v40, 0  ;;  %1138 = vst.msk [vmem:[%s2694_s24] sm:$0xff] %vm1137_vm1, %v1129_v53  ;;  %v827_v21 = vand.u32 8388607, %v820_v11  ;;  %v2764_v6 = vmul.f32 %v2388_v17, %v274_v37 }
  0xef   : > { %1986 = vst.msk [vmem:[%s2700_s27] sm:$0xff] %vm1137_vm1, %v1978_v41  ;;  %v471_v36 = vshll.u32 %v470_v45, 30  ;;  %v834_v24 = vand.u32 31, %v832_v63  ;;  %v2760_v7 = vand.u32 3, %v703_v51  ;;  %vm410_vm2 = vcmp.lt.s32.totalorder %v2409_v46, 0 }
  0xf0   : > { %v697_v26 = vmul.f32 %v696_v59, %v694_v22  ;;  %v2766_v8 = vand.u32 3, %v1551_v1  ;;  %v464_v20 = vadd.s32 %v2657_v10, %v2715_v3  ;;  %v828_v14 = vor.u32 8388608, %v827_v21 }
  0xf1   : > { %v2758_v31 = vsub.s32 %v468_v18, %v471_v36  ;;  %v835_v54 = vsub.s32 32, %v834_v24  ;;  %v494_v61 = vsub.s32 4, %v470_v45  ;;  %v2780_v10 = vshrl.u32 %v832_v63, 5 }
  0xf2   : > { %v698_v4 = vxor.u32 2147483648, %v697_v26  ;;  %v837_v3 = vshll.u32 %v2335_v52, %v834_v24  ;;  %v840_v23 = vshll.u32 %v2336_v56, %v834_v24  ;;  %v843_v25 = vshll.u32 %v2337_v58, %v834_v24 }
  0xf3   : > { %v474_v12 = vsub.s32 0, %v2758_v31  ;;  %v838_v0 = vshrl.u32 %v2336_v56, %v835_v54  ;;  %v841_v15 = vshrl.u32 %v2337_v58, %v835_v54  ;;  %v844_v16 = vshrl.u32 %v2338_v60, %v835_v54 }
  0xf4   : > { %v699_v50 = vsel %vm616_vm6, %v698_v4, %v697_v26  ;;  %v2785_v29 = vshll.u32 %v828_v14, 8  ;;  %v720_v57 = vand.u32 2139095040, %v2764_v6  ;;  %v846_v13 = vshll.u32 %v2338_v60, %v834_v24 }
  0xf5   : > { %v702_v17 = vsel %vm2709_vm13, %v2401_v28, %v699_v50  ;;  %v2148_v2 = vmin.u32 %v474_v12, %v2758_v31  ;;  %v839_v32 = vor.u32 %v838_v0, %v837_v3  ;;  %v842_v30 = vor.u32 %v841_v15, %v840_v23 }
  0xf6   : > { %2285 = vcosq.f32 %v702_v17  ;;  %v845_v9 = vor.u32 %v844_v16, %v843_v25  ;;  %v847_v18 = vshrl.u32 %v2339_v62, %v835_v54  ;;  %v849_v48 = vshll.u32 %v2339_v62, %v834_v24 }
  0xf7   : > { %2287 = vsinq.f32 %v702_v17  ;;  %v476_v44 = vclz %v2148_v2  ;;  %v850_v34 = vshrl.u32 %v2340_v5, %v835_v54  ;;  %v495_v35 = vsel %vm410_vm2, %v494_v61, %v470_v45 }
  0xf8   : > { %v836_v38 = vshrl.u32 %v2335_v52, %v835_v54  ;;  %vm852_vm3 = vcmp.lt.s32.totalorder %v2780_v10, 1  ;;  %vm853_vm4 = vcmp.lt.s32.totalorder %v2780_v10, 2  ;;  %vm2799_vm5 = vcmp.le.f32.partialorder %v408_v55, 0.7853982 }
  0xf9   : > { %v2149_v19 = vadd.s32 4294967294, %v476_v44  ;;  %v848_v49 = vor.u32 %v847_v18, %v846_v13  ;;  %v851_v39 = vor.u32 %v850_v34, %v849_v48  ;;  %vm855_vm7 = vcmp.lt.s32.totalorder %v2780_v10, 4 }
  0xfa   : > { %vm854_vm8 = vcmp.lt.s32.totalorder %v2780_v10, 3  ;;  %v856_v47 = vsel %vm852_vm3, %v836_v38, %v839_v32  ;;  %v857_v42 = vsel %vm855_vm7, %v845_v9, 2102212464  ;;  %vm712_vm9 = vcmp.eq.s32.totalorder %v2760_v7, 2 }
  0xfb   : > { %vm2150_vm6 = vcmp.lt.s32.totalorder %v2149_v19, 0  ;;  %v860_v53 = vsel %vm852_vm3, %v839_v32, %v842_v30  ;;  %v864_v41 = vsel %vm852_vm3, %v842_v30, %v845_v9  ;;  %vm709_vm11 = vcmp.eq.s32.totalorder %v2760_v7, 0 }
  0xfc   : > { %v479_v40 = vsel %vm2150_vm6, 0, %v2149_v19  ;;  %v861_v45 = vsel %vm855_vm7, %v848_v49, 920167782  ;;  %v865_v22 = vsel %vm855_vm7, %v851_v39, 1326507024  ;;  %v721_v59 = vshrl.u32 %v720_v57, 23 }
  0xfd   : > { %v480_v43 = vsub.s32 32, %v479_v40  ;;  %v484_v51 = vsub.s32 4294967266, %v479_v40  ;;  %v481_v55 = vshll.u32 %v2758_v31, %v479_v40  ;;  %vm708_vm12 = vcmp.lt.s32.totalorder %v2760_v7, 2 }
  0xfe   : > { %v862_v36 = vsel %vm854_vm8, %v845_v9, %v861_v45  ;;  %v866_v21 = vsel %vm854_vm8, %v848_v49, %v865_v22  ;;  %vm706_vm10 = vweird.f32 %v2401_v28  ;;  %v858_v24 = vsel %vm854_vm8, %v842_v30, %v857_v42 }
  0xff   : > { %v482_v63 = vshrl.u32 %v464_v20, %v480_v43  ;;  %v485_v1 = vadd.s32 127, %v484_v51  ;;  %v863_v37 = vsel %vm853_vm4, %v860_v53, %v862_v36  ;;  %v867_v26 = vsel %vm853_vm4, %v864_v41, %v866_v21 }
 0x100   : > { %v2159_v31 = vadd.s32 4294967169, %v721_v59  ;;  %v2821_v20 = vmul.u32.u64.low %v2785_v29, %v867_v26  ;;  %v2822_v12 = vmul.u32.u64.high %v2785_v29, %v867_v26, %v2821_v20  ;;  %vm1553_vm13 = vcmp.lt.s32.totalorder %v2766_v8, 2 }
 0x101   : > { %v483_v54 = vor.u32 %v482_v63, %v481_v55  ;;  %v486_v4 = vshll.u32 %v485_v1, 23  ;;  %v2826_v14 = vmul.u32.u64.low %v2785_v29, %v863_v37  ;;  %v2827_v50 = vmul.u32.u64.high %v2785_v29, %v863_v37, %v2826_v14 }
 0x102   : > { %v727_v0 = vadd.s32 1, %v2159_v31  ;;  %vm1554_vm14 = vcmp.eq.s32.totalorder %v2766_v8, 0  ;;  %vm1557_vm15 = vcmp.eq.s32.totalorder %v2766_v8, 2  ;;  %v717_v17 = vand.u32 2147483647, %v2764_v6 }
 0x103   : > { %v2286_v15 = vpop.eup %2285  ;;  %v487_v16 = vor.u32 4788187, %v486_v4  ;;  %v497_v3 = vsel %vm2799_vm5, 0, %v495_v35  ;;  %v859_v23 = vsel %vm853_vm4, %v856_v47, %v858_v24  ;;  %v490_v57 = vcvt.s32.f32 %v483_v54 }
 0x104   : > { %v2288_v2 = vpop.eup %2287  ;;  %v713_v61 = vxor.u32 2147483648, %v2286_v15  ;;  %vm728_vm0 = vcmp.gt.s32.totalorder %v727_v0, 0  ;;  %vm877_vm3 = vc.u32 %v2822_v12, %v2826_v14  ;;  %v878_v9 = vadd.s32 1, %v2827_v50 }
 0x105   : > { %v710_v25 = vxor.u32 2147483648, %v2288_v2  ;;  %v488_v44 = vand.u32 2147483647, %v487_v16  ;;  %v729_v13 = vsel %vm728_vm0, %v727_v0, 0  ;;  %v875_v48 = vmul.u32 %v2785_v29, %v859_v23 }
 0x106   : > { %v714_v32 = vsel %vm712_vm9, %v713_v61, %v2288_v2  ;;  %v1559_v30 = vsel %vm1557_vm15, %v713_v61, %v2288_v2  ;;  %v879_v38 = vsel %vm877_vm3, %v878_v9, %v2827_v50  ;;  %v731_v49 = vand.u32 31, %v729_v13 }
 0x107   : > { %v711_v19 = vsel %vm709_vm11, %v2286_v15, %v710_v25  ;;  %v1556_v10 = vsel %vm1554_vm14, %v2286_v15, %v710_v25  ;;  %v491_v18 = vmul.f32 %v490_v57, %v488_v44  ;;  %v880_v42 = vadd.s32 %v879_v38, %v875_v48 }
 0x108   : > { %v715_v34 = vsel %vm708_vm12, %v711_v19, %v714_v32  ;;  %v1560_v35 = vsel %vm1553_vm13, %v1556_v10, %v1559_v30  ;;  %v732_v51 = vsub.s32 32, %v731_v49  ;;  %v1343_v53 = vadd.s32 3, %v497_v3  ;;  %v289_v30 = vpop.permute.xlu1 %288 }
 0x109   : > { %v716_v39 = vsel %vm706_vm10, nan, %v715_v34  ;;  %v1561_v40 = vsel %vm706_vm10, nan, %v1560_v35  ;;  %v492_v47 = vxor.u32 2147483648, %v491_v18  ;;  %v881_v8 = vadd.s32 536870912, %v880_v42 }
 0x10a   : > { %v1132_v43 = vmul.f32 1.1338934, %v716_v39  ;;  %v1981_v29 = vmul.f32 1.1338934, %v1561_v40  ;;  %v724_v28 = vand.u32 8388607, %v717_v17  ;;  %v735_v55 = vshrl.u32 %v2336_v56, %v732_v51 }
 0x10b   : > { %v493_v7 = vsel %vm410_vm2, %v492_v47, %v491_v18  ;;  %v738_v45 = vshrl.u32 %v2337_v58, %v732_v51  ;;  %v2869_v22 = vshrl.u32 %v881_v8, 30  ;;  %v734_v59 = vshll.u32 %v2335_v52, %v731_v49 }
 0x10c   : > { %1141 = vst.msk [vmem:[%s2694_s24 + $0x18] sm:$0xff] %vm1137_vm1, %v1132_v43  ;;  %1989 = vst.msk [vmem:[%s2700_s27 + $0x18] sm:$0xff] %vm1137_vm1, %v1981_v29  ;;  %v496_v41 = vsel %vm2799_vm5, %v2409_v46, %v493_v7  ;;  %v741_v63 = vshrl.u32 %v2338_v60, %v732_v51  ;;  %v737_v1 = vshll.u32 %v2336_v56, %v731_v49  ;;  %v730_v24 = vshrl.u32 %v729_v13, 5 }
 0x10d   : > { %2289 = vcosq.f32 %v496_v41  ;;  %v743_v33 = vshll.u32 %v2338_v60, %v731_v49  ;;  %v744_v36 = vshrl.u32 %v2339_v62, %v732_v51  ;;  %v883_v21 = vshll.u32 %v2869_v22, 30 }
 0x10e   : > { %2291 = vsinq.f32 %v496_v41  ;;  %v736_v37 = vor.u32 %v735_v55, %v734_v59  ;;  %v740_v26 = vshll.u32 %v2337_v58, %v731_v49  ;;  %v739_v31 = vor.u32 %v738_v45, %v737_v1 }
 0x10f   : > { %v745_v54 = vor.u32 %v744_v36, %v743_v33  ;;  %v746_v4 = vshll.u32 %v2339_v62, %v731_v49  ;;  %v747_v20 = vshrl.u32 %v2340_v5, %v732_v51  ;;  %v501_v50 = vand.u32 3, %v497_v3  ;;  %v2309_v49 = vld [vmem:[%s3156_s1] ss:$0 sm:$0xff] }
 0x110   : > { %v2880_v0 = vsub.s32 %v880_v42, %v883_v21  ;;  %v742_v15 = vor.u32 %v741_v63, %v740_v26  ;;  %v725_v61 = vor.u32 8388608, %v724_v28  ;;  %vm749_vm2 = vcmp.lt.s32.totalorder %v730_v24, 1 }
 0x111   : > { %v748_v16 = vor.u32 %v747_v20, %v746_v4  ;;  %vm752_vm4 = vcmp.lt.s32.totalorder %v730_v24, 4  ;;  %v1344_v23 = vand.u32 3, %v1343_v53  ;;  %v757_v25 = vsel %vm749_vm2, %v736_v37, %v739_v31 }
 0x112   : > { %v886_v2 = vsub.s32 0, %v2880_v0  ;;  %v758_v44 = vsel %vm752_vm4, %v745_v54, 920167782  ;;  %vm503_vm5 = vcmp.eq.s32.totalorder %v501_v50, 0  ;;  %v733_v32 = vshrl.u32 %v2335_v52, %v732_v51 }
 0x113   : > { %vm751_vm6 = vcmp.lt.s32.totalorder %v730_v24, 3  ;;  %v761_v3 = vsel %vm749_vm2, %v739_v31, %v742_v15  ;;  %vm502_vm7 = vcmp.lt.s32.totalorder %v501_v50, 2  ;;  %vm750_vm8 = vcmp.lt.s32.totalorder %v730_v24, 2 }
 0x114   : > { %v2164_v57 = vmin.u32 %v886_v2, %v2880_v0  ;;  %v754_v9 = vsel %vm752_vm4, %v742_v15, 2102212464  ;;  %v759_v13 = vsel %vm751_vm6, %v742_v15, %v758_v44  ;;  %v762_v19 = vsel %vm752_vm4, %v748_v16, 1326507024 }
 0x115   : > { %vm500_vm9 = vweird.f32 %v2409_v46  ;;  %v760_v18 = vsel %vm750_vm8, %v757_v25, %v759_v13  ;;  %v763_v48 = vsel %vm751_vm6, %v745_v54, %v762_v19  ;;  %v765_v34 = vshll.u32 %v725_v61, 8  ;;  %v284_v54 = vpop.permute.xlu0 %283 }
 0x116   : > { %v888_v10 = vclz %v2164_v57  ;;  %vm506_vm11 = vcmp.eq.s32.totalorder %v501_v50, 2  ;;  %v753_v35 = vsel %vm749_vm2, %v733_v32, %v736_v37  ;;  %v764_v38 = vsel %vm750_vm8, %v761_v3, %v763_v48 }
 0x117   : > { %v2896_v39 = vmul.f32 %v2309_v49, %v289_v30  ;;  %v755_v47 = vsel %vm751_vm6, %v739_v31, %v754_v9  ;;  %v2899_v42 = vmul.u32.u64.low %v765_v34, %v764_v38  ;;  %v2900_v43 = vmul.u32.u64.high %v765_v34, %v764_v38, %v2899_v42 }
 0x118   : > { %v2165_v40 = vadd.s32 4294967294, %v888_v10  ;;  %vm1345_vm12 = vcmp.lt.s32.totalorder %v1344_v23, 2  ;;  %vm1346_vm10 = vcmp.eq.s32.totalorder %v1344_v23, 0  ;;  %vm822_vm13 = vcmp.lt.s32.totalorder %v2590_v27, 0 }
 0x119   : > { %v2903_v51 = vmul.u32.u64.low %v765_v34, %v760_v18  ;;  %v2904_v7 = vmul.u32.u64.high %v765_v34, %v760_v18, %v2903_v51  ;;  %vm1349_vm14 = vcmp.eq.s32.totalorder %v1344_v23, 2  ;;  %v876_v41 = vadd.s32 %v2826_v14, %v2822_v12 }
 0x11a   : > { %v2290_v29 = vpop.eup %2289  ;;  %vm2166_vm15 = vcmp.lt.s32.totalorder %v2165_v40, 0  ;;  %v906_v45 = vsub.s32 4, %v2869_v22  ;;  %v756_v59 = vsel %vm750_vm8, %v753_v35, %v755_v47  ;;  %v1029_v36 = vand.u32 2139095040, %v2896_v39 }
 0x11b   : > { %v2292_v53 = vpop.eup %2291  ;;  %v507_v8 = vxor.u32 2147483648, %v2290_v29  ;;  %v891_v55 = vsel %vm2166_vm15, 0, %v2165_v40  ;;  %vm774_vm0 = vc.u32 %v2900_v43, %v2903_v51  ;;  %v772_v2 = vmul.u32 %v765_v34, %v756_v59 }
 0x11c   : > { %v504_v28 = vxor.u32 2147483648, %v2292_v53  ;;  %v892_v33 = vsub.s32 32, %v891_v55  ;;  %v893_v26 = vshll.u32 %v2880_v0, %v891_v55  ;;  %v896_v12 = vsub.s32 4294967266, %v891_v55 }
 0x11d   : > { %v508_v63 = vsel %vm506_vm11, %v507_v8, %v2292_v53  ;;  %v1351_v1 = vsel %vm1349_vm14, %v507_v8, %v2292_v53  ;;  %v775_v0 = vadd.s32 1, %v2904_v7  ;;  %v1030_v61 = vshrl.u32 %v1029_v36, 23 }
 0x11e   : > { %v505_v21 = vsel %vm503_vm5, %v2290_v29, %v504_v28  ;;  %v1348_v37 = vsel %vm1346_vm10, %v2290_v29, %v504_v28  ;;  %v894_v24 = vshrl.u32 %v876_v41, %v892_v33  ;;  %v897_v15 = vadd.s32 127, %v896_v12 }
 0x11f   : > { %v509_v14 = vsel %vm502_vm7, %v505_v21, %v508_v63  ;;  %v1352_v31 = vsel %vm1345_vm12, %v1348_v37, %v1351_v1  ;;  %v776_v44 = vsel %vm774_vm0, %v775_v0, %v2904_v7  ;;  %v2926_v57 = vmul.f32 %v2309_v49, %v284_v54 }
 0x120   : > { %v510_v4 = vsel %vm500_vm9, nan, %v509_v14  ;;  %v1353_v20 = vsel %vm500_vm9, nan, %v1352_v31  ;;  %v895_v23 = vor.u32 %v894_v24, %v893_v26  ;;  %v898_v25 = vshll.u32 %v897_v15, 23 }
 0x121   : > { %v1130_v50 = vmul.f32 1.1338934, %v510_v4  ;;  %v1979_v16 = vmul.f32 1.1338934, %v1353_v20  ;;  %v907_v46 = vsel %vm822_vm13, %v906_v45, %v2869_v22  ;;  %v777_v32 = vadd.s32 %v776_v44, %v772_v2 }
 0x122   : > { %v1026_v3 = vand.u32 2147483647, %v2896_v39  ;;  %v2171_v30 = vadd.s32 4294967169, %v1030_v61  ;;  %v899_v9 = vor.u32 4788187, %v898_v25  ;;  %v902_v48 = vcvt.s32.f32 %v895_v23 }
 0x123   : > { %1139 = vst.msk [vmem:[%s2694_s24 + $0x8] sm:$0xff] %vm1137_vm1, %v1130_v50  ;;  %1987 = vst.msk [vmem:[%s2700_s27 + $0x8] sm:$0xff] %vm1137_vm1, %v1979_v16  ;;  %vm2938_vm3 = vcmp.le.f32.partialorder %v820_v11, 0.7853982  ;;  %v778_v19 = vadd.s32 536870912, %v777_v32  ;;  %v926_v38 = vand.u32 2139095040, %v2926_v57  ;;  %v773_v63 = vadd.s32 %v2903_v51, %v2900_v43 }
 0x124   : > { %v1036_v10 = vadd.s32 1, %v2171_v30  ;;  %v900_v18 = vand.u32 2147483647, %v899_v9  ;;  %v909_v34 = vsel %vm2938_vm3, 0, %v907_v46  ;;  %v1033_v22 = vand.u32 8388607, %v1026_v3 }
 0x125   : > { %v2944_v35 = vshrl.u32 %v778_v19, 30  ;;  %v1759_v40 = vadd.s32 3, %v909_v34  ;;  %v927_v41 = vshrl.u32 %v926_v38, 23  ;;  %v2954_v55 = vand.u32 3, %v909_v34 }
 0x126   : > { %vm1037_vm2 = vcmp.gt.s32.totalorder %v1036_v10, 0  ;;  %v903_v49 = vmul.f32 %v902_v48, %v900_v18  ;;  %v1034_v53 = vor.u32 8388608, %v1033_v22  ;;  %vm719_vm4 = vcmp.lt.s32.totalorder %v2764_v6, 0 }
 0x127   : > { %v1038_v11 = vsel %vm1037_vm2, %v1036_v10, 0  ;;  %v780_v47 = vshll.u32 %v2944_v35, 30  ;;  %v2959_v59 = vand.u32 3, %v1759_v40  ;;  %v2167_v12 = vadd.s32 4294967169, %v927_v41 }
 0x128   : > { %v1040_v42 = vand.u32 31, %v1038_v11  ;;  %v904_v29 = vxor.u32 2147483648, %v903_v49  ;;  %v2968_v26 = vshll.u32 %v1034_v53, 8  ;;  %v1039_v14 = vshrl.u32 %v1038_v11, 5 }
 0x129   : > { %v2950_v7 = vsub.s32 %v777_v32, %v780_v47  ;;  %v803_v15 = vsub.s32 4, %v2944_v35  ;;  %v933_v44 = vadd.s32 1, %v2167_v12  ;;  %vm918_vm8 = vcmp.eq.s32.totalorder %v2954_v55, 2 }
 0x12a   : > { %v1041_v8 = vsub.s32 32, %v1040_v42  ;;  %v905_v28 = vsel %vm822_vm13, %v904_v29, %v903_v49  ;;  %v1043_v33 = vshll.u32 %v2335_v52, %v1040_v42  ;;  %v1046_v24 = vshll.u32 %v2336_v56, %v1040_v42 }
 0x12b   : > { %v908_v45 = vsel %vm2938_vm3, %v2590_v27, %v905_v28  ;;  %v783_v1 = vsub.s32 0, %v2950_v7  ;;  %v1049_v43 = vshll.u32 %v2337_v58, %v1040_v42  ;;  %v1052_v4 = vshll.u32 %v2338_v60, %v1040_v42 }
 0x12c   : > { %2293 = vcosq.f32 %v908_v45  ;;  %v1044_v36 = vshrl.u32 %v2336_v56, %v1041_v8  ;;  %v1047_v21 = vshrl.u32 %v2337_v58, %v1041_v8  ;;  %v1050_v54 = vshrl.u32 %v2338_v60, %v1041_v8 }
 0x12d   : > { %2295 = vsinq.f32 %v908_v45  ;;  %v2160_v37 = vmin.u32 %v783_v1, %v2950_v7  ;;  %v1053_v20 = vshrl.u32 %v2339_v62, %v1041_v8  ;;  %v1042_v0 = vshrl.u32 %v2335_v52, %v1041_v8 }
 0x12e   : > { %v1045_v31 = vor.u32 %v1044_v36, %v1043_v33  ;;  %v1048_v50 = vor.u32 %v1047_v21, %v1046_v24  ;;  %v1055_v16 = vshll.u32 %v2339_v62, %v1040_v42  ;;  %v1051_v61 = vor.u32 %v1050_v54, %v1049_v43 }
 0x12f   : > { %v785_v51 = vclz %v2160_v37  ;;  %v1054_v23 = vor.u32 %v1053_v20, %v1052_v4  ;;  %v1056_v25 = vshrl.u32 %v2340_v5, %v1041_v8  ;;  %vm1058_vm5 = vcmp.lt.s32.totalorder %v1039_v14, 1 }
 0x130   : > { %vm1060_vm6 = vcmp.lt.s32.totalorder %v1039_v14, 3  ;;  %vm1061_vm7 = vcmp.lt.s32.totalorder %v1039_v14, 4  ;;  %v1062_v32 = vsel %vm1058_vm5, %v1042_v0, %v1045_v31  ;;  %vm915_vm11 = vcmp.eq.s32.totalorder %v2954_v55, 0 }
 0x131   : > { %v2161_v2 = vadd.s32 4294967294, %v785_v51  ;;  %v1057_v46 = vor.u32 %v1056_v25, %v1055_v16  ;;  %v1063_v30 = vsel %vm1061_vm7, %v1051_v61, 2102212464  ;;  %vm1762_vm12 = vcmp.eq.s32.totalorder %v2959_v59, 0 }
 0x132   : > { %v1064_v13 = vsel %vm1060_vm6, %v1048_v50, %v1063_v30  ;;  %v1066_v19 = vsel %vm1058_vm5, %v1045_v31, %v1048_v50  ;;  %v1067_v10 = vsel %vm1061_vm7, %v1054_v23, 920167782  ;;  %vm914_vm10 = vcmp.lt.s32.totalorder %v2954_v55, 2 }
 0x133   : > { %vm2162_vm9 = vcmp.lt.s32.totalorder %v2161_v2, 0  ;;  %vm1761_vm13 = vcmp.lt.s32.totalorder %v2959_v59, 2  ;;  %vm1059_vm14 = vcmp.lt.s32.totalorder %v1039_v14, 2  ;;  %vm912_vm15 = vweird.f32 %v2590_v27 }
 0x134   : > { %v788_v9 = vsel %vm2162_vm9, 0, %v2161_v2  ;;  %v1065_v22 = vsel %vm1059_vm14, %v1062_v32, %v1064_v13  ;;  %v1068_v38 = vsel %vm1060_vm6, %v1051_v61, %v1067_v10  ;;  %v1070_v49 = vsel %vm1058_vm5, %v1048_v50, %v1051_v61 }
 0x135   : > { %v789_v18 = vsub.s32 32, %v788_v9  ;;  %v790_v48 = vshll.u32 %v2950_v7, %v788_v9  ;;  %v793_v34 = vsub.s32 4294967266, %v788_v9  ;;  %v1071_v11 = vsel %vm1061_vm7, %v1057_v46, 1326507024 }
 0x136   : > { %v1069_v42 = vsel %vm1059_vm14, %v1066_v19, %v1068_v38  ;;  %v1072_v29 = vsel %vm1060_vm6, %v1054_v23, %v1071_v11  ;;  %vm934_vm0 = vcmp.gt.s32.totalorder %v933_v44, 0  ;;  %vm1765_vm3 = vcmp.eq.s32.totalorder %v2959_v59, 2 }
 0x137   : > { %v791_v40 = vshrl.u32 %v773_v63, %v789_v18  ;;  %v794_v47 = vadd.s32 127, %v793_v34  ;;  %v1073_v53 = vsel %vm1059_vm14, %v1070_v49, %v1072_v29  ;;  %v923_v21 = vand.u32 2147483647, %v2926_v57 }
 0x138   : > { %v2997_v8 = vmul.u32.u64.low %v2968_v26, %v1069_v42  ;;  %v2998_v7 = vmul.u32.u64.high %v2968_v26, %v1069_v42, %v2997_v8  ;;  %v3002_v1 = vmul.u32.u64.low %v2968_v26, %v1073_v53  ;;  %v3003_v33 = vmul.u32.u64.high %v2968_v26, %v1073_v53, %v3002_v1 }
 0x139   : > { %v2294_v41 = vpop.eup %2293  ;;  %v792_v28 = vor.u32 %v791_v40, %v790_v48  ;;  %v795_v45 = vshll.u32 %v794_v47, 23  ;;  %v935_v37 = vsel %vm934_vm0, %v933_v44, 0  ;;  %v804_v31 = vsel %vm719_vm4, %v803_v15, %v2944_v35 }
 0x13a   : > { %v2296_v36 = vpop.eup %2295  ;;  %v919_v63 = vxor.u32 2147483648, %v2294_v41  ;;  %v1081_v24 = vmul.u32 %v2968_v26, %v1065_v22  ;;  %v1084_v54 = vadd.s32 1, %v2998_v7  ;;  %v937_v4 = vand.u32 31, %v935_v37 }
 0x13b   : > { %v916_v12 = vxor.u32 2147483648, %v2296_v36  ;;  %v796_v14 = vor.u32 4788187, %v795_v45  ;;  %v799_v16 = vcvt.s32.f32 %v792_v28  ;;  %vm1083_vm2 = vc.u32 %v3003_v33, %v2997_v8 }
 0x13c   : > { %v920_v43 = vsel %vm918_vm8, %v919_v63, %v2296_v36  ;;  %v1767_v51 = vsel %vm1765_vm3, %v919_v63, %v2296_v36  ;;  %v938_v15 = vsub.s32 32, %v937_v4  ;;  %v1085_v25 = vsel %vm1083_vm2, %v1084_v54, %v2998_v7 }
 0x13d   : > { %v917_v20 = vsel %vm915_vm11, %v2294_v41, %v916_v12  ;;  %v1764_v0 = vsel %vm1762_vm12, %v2294_v41, %v916_v12  ;;  %v797_v50 = vand.u32 2147483647, %v796_v14  ;;  %vm3031_vm5 = vcmp.le.f32.partialorder %v717_v17, 0.7853982 }
 0x13e   : > { %v921_v35 = vsel %vm914_vm10, %v917_v20, %v920_v43  ;;  %v1768_v26 = vsel %vm1761_vm13, %v1764_v0, %v1767_v51  ;;  %v1086_v46 = vadd.s32 %v1085_v25, %v1081_v24  ;;  %v806_v30 = vsel %vm3031_vm5, 0, %v804_v31 }
 0x13f   : > { %v922_v2 = vsel %vm912_vm15, nan, %v921_v35  ;;  %v1769_v61 = vsel %vm912_vm15, nan, %v1768_v26  ;;  %v800_v23 = vmul.f32 %v799_v16, %v797_v50  ;;  %v930_v27 = vand.u32 8388607, %v923_v21 }
 0x140   : > { %v1134_v55 = vmul.f32 1.1338934, %v922_v2  ;;  %v1983_v44 = vmul.f32 1.1338934, %v1769_v61  ;;  %v3039_v9 = vshrl.u32 %v935_v37, 5  ;;  %v1087_v13 = vadd.s32 536870912, %v1086_v46 }
 0x141   : > { %v801_v32 = vxor.u32 2147483648, %v800_v23  ;;  %v940_v17 = vshll.u32 %v2335_v52, %v937_v4  ;;  %v941_v19 = vshrl.u32 %v2336_v56, %v938_v15  ;;  %v944_v10 = vshrl.u32 %v2337_v58, %v938_v15 }
 0x142   : > { %1143 = vst.msk [vmem:[%s2694_s24 + $0x28] sm:$0xff] %vm1137_vm1, %v1134_v55  ;;  %1991 = vst.msk [vmem:[%s2700_s27 + $0x28] sm:$0xff] %vm1137_vm1, %v1983_v44  ;;  %v947_v48 = vshrl.u32 %v2338_v60, %v938_v15  ;;  %v949_v34 = vshll.u32 %v2338_v60, %v937_v4  ;;  %v950_v22 = vshrl.u32 %v2339_v62, %v938_v15  ;;  %v3056_v49 = vshrl.u32 %v1087_v13, 30 }
 0x143   : > { %v802_v18 = vsel %vm719_vm4, %v801_v32, %v800_v23  ;;  %v943_v11 = vshll.u32 %v2336_v56, %v937_v4  ;;  %v946_v40 = vshll.u32 %v2337_v58, %v937_v4  ;;  %v952_v42 = vshll.u32 %v2339_v62, %v937_v4 }
 0x144   : > { %v805_v38 = vsel %vm3031_vm5, %v2764_v6, %v802_v18  ;;  %v951_v47 = vor.u32 %v950_v22, %v949_v34  ;;  %v953_v29 = vshrl.u32 %v2340_v5, %v938_v15  ;;  %v1089_v60 = vshll.u32 %v3056_v49, 30 }
 0x145   : > { %2297 = vcosq.f32 %v805_v38  ;;  %v942_v53 = vor.u32 %v941_v19, %v940_v17  ;;  %v945_v7 = vor.u32 %v944_v10, %v943_v11  ;;  %v948_v41 = vor.u32 %v947_v48, %v946_v40 }
 0x146   : > { %2299 = vsinq.f32 %v805_v38  ;;  %v954_v28 = vor.u32 %v953_v29, %v952_v42  ;;  %v3063_v45 = vsub.s32 %v1086_v46, %v1089_v60  ;;  %v931_v1 = vor.u32 8388608, %v930_v27 }
 0x147   : > { %vm958_vm4 = vcmp.lt.s32.totalorder %v3039_v9, 4  ;;  %v1655_v56 = vadd.s32 3, %v806_v30  ;;  %vm955_vm6 = vcmp.lt.s32.totalorder %v3039_v9, 1  ;;  %vm957_vm7 = vcmp.lt.s32.totalorder %v3039_v9, 3 }
 0x148   : > { %v964_v58 = vsel %vm958_vm4, %v951_v47, 920167782  ;;  %v1092_v62 = vsub.s32 0, %v3063_v45  ;;  %v963_v5 = vsel %vm955_vm6, %v942_v53, %v945_v7  ;;  %v967_v63 = vsel %vm955_vm6, %v945_v7, %v948_v41 }
 0x149   : > { %v965_v36 = vsel %vm957_vm7, %v948_v41, %v964_v58  ;;  %v968_v37 = vsel %vm958_vm4, %v954_v28, 1326507024  ;;  %v810_v12 = vand.u32 3, %v806_v30  ;;  %vm956_vm8 = vcmp.lt.s32.totalorder %v3039_v9, 2 }
 0x14a   : > { %v2172_v14 = vmin.u32 %v1092_v62, %v3063_v45  ;;  %v971_v31 = vshll.u32 %v931_v1, 8  ;;  %v1656_v24 = vand.u32 3, %v1655_v56  ;;  %v960_v43 = vsel %vm958_vm4, %v948_v41, 2102212464 }
 0x14b   : > { %v966_v51 = vsel %vm956_vm8, %v963_v5, %v965_v36  ;;  %v969_v54 = vsel %vm957_vm7, %v951_v47, %v968_v37  ;;  %vm809_vm9 = vweird.f32 %v2764_v6  ;;  %v939_v16 = vshrl.u32 %v2335_v52, %v938_v15 }
 0x14c   : > { %v1094_v4 = vclz %v2172_v14  ;;  %v970_v20 = vsel %vm956_vm8, %v967_v63, %v969_v54  ;;  %v3083_v0 = vmul.u32.u64.low %v971_v31, %v966_v51  ;;  %v3084_v50 = vmul.u32.u64.high %v971_v31, %v966_v51, %v3083_v0 }
 0x14d   : > { %vm811_vm11 = vcmp.lt.s32.totalorder %v810_v12, 2  ;;  %v3089_v26 = vmul.u32.u64.low %v971_v31, %v970_v20  ;;  %v3090_v2 = vmul.u32.u64.high %v971_v31, %v970_v20, %v3089_v26  ;;  %vm812_vm12 = vcmp.eq.s32.totalorder %v810_v12, 0 }
 0x14e   : > { %v2173_v35 = vadd.s32 4294967294, %v1094_v4  ;;  %vm815_vm10 = vcmp.eq.s32.totalorder %v810_v12, 2  ;;  %v959_v61 = vsel %vm955_vm6, %v939_v16, %v942_v53  ;;  %v961_v23 = vsel %vm957_vm7, %v945_v7, %v960_v43 }
 0x14f   : > { %vm1657_vm13 = vcmp.lt.s32.totalorder %v1656_v24, 2  ;;  %vm1658_vm14 = vcmp.eq.s32.totalorder %v1656_v24, 0  ;;  %vm1661_vm15 = vcmp.eq.s32.totalorder %v1656_v24, 2  ;;  %v1082_v15 = vadd.s32 %v2997_v8, %v3003_v33 }
 0x150   : > { %vm2174_vm0 = vcmp.lt.s32.totalorder %v2173_v35, 0  ;;  %v981_v59 = vadd.s32 1, %v3084_v50  ;;  %v962_v27 = vsel %vm956_vm8, %v959_v61, %v961_v23  ;;  %vm980_vm3 = vc.u32 %v3090_v2, %v3083_v0 }
 0x151   : > { %v1097_v44 = vsel %vm2174_vm0, 0, %v2173_v35  ;;  %v978_v34 = vmul.u32 %v971_v31, %v962_v27  ;;  %vm1028_vm2 = vcmp.lt.s32.totalorder %v2896_v39, 0  ;;  %v1112_v58 = vsub.s32 4, %v3056_v49 }
 0x152   : > { %v2298_v25 = vpop.eup %2297  ;;  %v1098_v32 = vsub.s32 32, %v1097_v44  ;;  %v1102_v30 = vsub.s32 4294967266, %v1097_v44  ;;  %v1099_v19 = vshll.u32 %v3063_v45, %v1097_v44  ;;  %v982_v22 = vsel %vm980_vm3, %v981_v59, %v3084_v50 }
 0x153   : > { %v2300_v55 = vpop.eup %2299  ;;  %v816_v52 = vxor.u32 2147483648, %v2298_v25  ;;  %v983_v60 = vadd.s32 %v982_v22, %v978_v34  ;;  %vm1027_vm5 = vcmp.le.f32.partialorder %v1026_v3, 0.7853982  ;;  %v1113_v37 = vsel %vm1028_vm2, %v1112_v58, %v3056_v49 }
 0x154   : > { %v813_v46 = vxor.u32 2147483648, %v2300_v55  ;;  %v1100_v33 = vshrl.u32 %v1082_v15, %v1098_v32  ;;  %v1103_v18 = vadd.s32 127, %v1102_v30  ;;  %v1115_v31 = vsel %vm1027_vm5, 0, %v1113_v37 }
 0x155   : > { %v817_v13 = vsel %vm815_vm10, %v816_v52, %v2300_v55  ;;  %v1663_v17 = vsel %vm1661_vm15, %v816_v52, %v2300_v55  ;;  %v984_v7 = vadd.s32 536870912, %v983_v60  ;;  %v1967_v43 = vadd.s32 3, %v1115_v31 }
 0x156   : > { %v814_v10 = vsel %vm812_vm12, %v2298_v25, %v813_v46  ;;  %v1660_v8 = vsel %vm1658_vm14, %v2298_v25, %v813_v46  ;;  %v1101_v40 = vor.u32 %v1100_v33, %v1099_v19  ;;  %v1104_v47 = vshll.u32 %v1103_v18, 23 }
 0x157   : > { %v818_v48 = vsel %vm811_vm11, %v814_v10, %v817_v13  ;;  %v1664_v9 = vsel %vm1657_vm13, %v1660_v8, %v1663_v17  ;;  %v3118_v45 = vshrl.u32 %v984_v7, 30  ;;  %v979_v54 = vadd.s32 %v3083_v0, %v3090_v2 }
 0x158   : > { %v819_v38 = vsel %vm809_vm9, nan, %v818_v48  ;;  %v1665_v11 = vsel %vm809_vm9, nan, %v1664_v9  ;;  %v1105_v53 = vor.u32 4788187, %v1104_v47  ;;  %v1108_v28 = vcvt.s32.f32 %v1101_v40 }
 0x159   : > { %v1133_v42 = vmul.f32 1.1338934, %v819_v38  ;;  %v1982_v29 = vmul.f32 1.1338934, %v1665_v11  ;;  %v986_v56 = vshll.u32 %v3118_v45, 30  ;;  %v1119_v20 = vand.u32 3, %v1115_v31 }
 0x15a   : > { %v1106_v41 = vand.u32 2147483647, %v1105_v53  ;;  %v1968_v50 = vand.u32 3, %v1967_v43  ;;  %vm1118_vm10 = vweird.f32 %v2896_v39  ;;  %vm925_vm13 = vcmp.lt.s32.totalorder %v2926_v57, 0 }
 0x15b   : > { %1142 = vst.msk [vmem:[%s2694_s24 + $0x20] sm:$0xff] %vm1137_vm1, %v1133_v42  ;;  %1990 = vst.msk [vmem:[%s2700_s27 + $0x20] sm:$0xff] %vm1137_vm1, %v1982_v29  ;;  %v987_v62 = vsub.s32 %v983_v60, %v986_v56  ;;  %vm1120_vm6 = vcmp.lt.s32.totalorder %v1119_v20, 2  ;;  %vm1121_vm7 = vcmp.eq.s32.totalorder %v1119_v20, 0  ;;  %vm1124_vm8 = vcmp.eq.s32.totalorder %v1119_v20, 2 }
 0x15c   : > { %v1109_v1 = vmul.f32 %v1108_v28, %v1106_v41  ;;  %vm1973_vm9 = vcmp.eq.s32.totalorder %v1968_v50, 2  ;;  %vm1969_vm11 = vcmp.lt.s32.totalorder %v1968_v50, 2  ;;  %vm1970_vm12 = vcmp.eq.s32.totalorder %v1968_v50, 0 }
 0x15d   : > { %v989_v63 = vsub.s32 0, %v987_v62  ;;  %v1009_v18 = vsub.s32 4, %v3118_v45  ;;  %vm924_vm14 = vcmp.le.f32.partialorder %v923_v21, 0.7853982 }
 0x15e   : > { %v1110_v6 = vxor.u32 2147483648, %v1109_v1 }
 0x15f   : > { %v2168_v12 = vmin.u32 %v989_v63, %v987_v62  ;;  %v1010_v9 = vsel %vm925_vm13, %v1009_v18, %v3118_v45 }
 0x160   : > { %v1111_v5 = vsel %vm1028_vm2, %v1110_v6, %v1109_v1  ;;  %v1012_v34 = vsel %vm924_vm14, 0, %v1010_v9 }
 0x161   : > { %v1114_v36 = vsel %vm1027_vm5, %v2896_v39, %v1111_v5  ;;  %v991_v14 = vclz %v2168_v12  ;;  %v1863_v22 = vadd.s32 3, %v1012_v34  ;;  %v1016_v38 = vand.u32 3, %v1012_v34 }
 0x162   : > { %2301 = vcosq.f32 %v1114_v36 }
 0x163   : > { %2303 = vsinq.f32 %v1114_v36  ;;  %v2169_v24 = vadd.s32 4294967294, %v991_v14  ;;  %v1864_v11 = vand.u32 3, %v1863_v22  ;;  %vm1021_vm15 = vcmp.eq.s32.totalorder %v1016_v38, 2 }
 0x164   : > { %vm1018_vm3 = vcmp.eq.s32.totalorder %v1016_v38, 0  ;;  %vm1017_vm5 = vcmp.lt.s32.totalorder %v1016_v38, 2 }
 0x165   : > { %vm2170_vm4 = vcmp.lt.s32.totalorder %v2169_v24, 0  ;;  %vm1869_vm0 = vcmp.eq.s32.totalorder %v1864_v11, 2  ;;  %vm1866_vm2 = vcmp.eq.s32.totalorder %v1864_v11, 0 }
 0x166   : > { %v994_v51 = vsel %vm2170_vm4, 0, %v2169_v24  ;;  %vm1865_vm4 = vcmp.lt.s32.totalorder %v1864_v11, 2 }
 0x167   : > { %v995_v4 = vsub.s32 32, %v994_v51  ;;  %v999_v3 = vsub.s32 4294967266, %v994_v51  ;;  %v996_v16 = vshll.u32 %v987_v62, %v994_v51 }
 0x169   : > { %v997_v35 = vshrl.u32 %v979_v54, %v995_v4  ;;  %v1000_v26 = vadd.s32 127, %v999_v3 }
 0x16b   : > { %v998_v49 = vor.u32 %v997_v35, %v996_v16  ;;  %v1001_v23 = vshll.u32 %v1000_v26, 23 }
 0x16d   : > { %v1002_v15 = vor.u32 4788187, %v1001_v23  ;;  %v1005_v32 = vcvt.s32.f32 %v998_v49 }
 0x16f   : > { %v2302_v61 = vpop.eup %2301  ;;  %v1003_v46 = vand.u32 2147483647, %v1002_v15 }
 0x170   : > { %v2304_v25 = vpop.eup %2303  ;;  %v1125_v55 = vxor.u32 2147483648, %v2302_v61 }
 0x171   : > { %v1122_v52 = vxor.u32 2147483648, %v2304_v25  ;;  %v1006_v19 = vmul.f32 %v1005_v32, %v1003_v46 }
 0x172   : > { %v1126_v44 = vsel %vm1124_vm8, %v1125_v55, %v2304_v25  ;;  %v1975_v0 = vsel %vm1973_vm9, %v1125_v55, %v2304_v25 }
 0x173   : > { %v1123_v2 = vsel %vm1121_vm7, %v2302_v61, %v1122_v52  ;;  %v1972_v59 = vsel %vm1970_vm12, %v2302_v61, %v1122_v52  ;;  %v1007_v33 = vxor.u32 2147483648, %v1006_v19 }
 0x174   : > { %v1127_v30 = vsel %vm1120_vm6, %v1123_v2, %v1126_v44  ;;  %v1976_v27 = vsel %vm1969_vm11, %v1972_v59, %v1975_v0  ;;  %vm1015_vm6 = vweird.f32 %v2926_v57 }
 0x175   : > { %v1128_v13 = vsel %vm1118_vm10, nan, %v1127_v30  ;;  %v1977_v17 = vsel %vm1118_vm10, nan, %v1976_v27  ;;  %v1008_v39 = vsel %vm925_vm13, %v1007_v33, %v1006_v19 }
 0x176   : > { %v1136_v10 = vmul.f32 1.1338934, %v1128_v13  ;;  %v1985_v8 = vmul.f32 1.1338934, %v1977_v17  ;;  %v1011_v48 = vsel %vm924_vm14, %v2926_v57, %v1008_v39 }
 0x177   : > { %2305 = vcosq.f32 %v1011_v48 }
 0x178   : > { %1145 = vst.msk [vmem:[%s2694_s24 + $0x38] sm:$0xff] %vm1137_vm1, %v1136_v10  ;;  %1993 = vst.msk [vmem:[%s2700_s27 + $0x38] sm:$0xff] %vm1137_vm1, %v1985_v8  ;;  %2307 = vsinq.f32 %v1011_v48 }
 0x184   : > { %v2306_v40 = vpop.eup %2305 }
 0x185   : > { %v2308_v47 = vpop.eup %2307  ;;  %v1022_v42 = vxor.u32 2147483648, %v2306_v40 }
 0x186   : > { %v1019_v29 = vxor.u32 2147483648, %v2308_v47 }
 0x187   : > { %v1023_v21 = vsel %vm1021_vm15, %v1022_v42, %v2308_v47  ;;  %v1871_v60 = vsel %vm1869_vm0, %v1022_v42, %v2308_v47 }
 0x188   : > { %v1020_v53 = vsel %vm1018_vm3, %v2306_v40, %v1019_v29  ;;  %v1868_v7 = vsel %vm1866_vm2, %v2306_v40, %v1019_v29 }
 0x189   : > { %v1024_v41 = vsel %vm1017_vm5, %v1020_v53, %v1023_v21  ;;  %v1872_v28 = vsel %vm1865_vm4, %v1868_v7, %v1871_v60 }
 0x18a   : > { %v1025_v45 = vsel %vm1015_vm6, nan, %v1024_v41  ;;  %v1873_v1 = vsel %vm1015_vm6, nan, %v1872_v28 }
 0x18b   : > { %v1135_v56 = vmul.f32 1.1338934, %v1025_v45  ;;  %v1984_v6 = vmul.f32 1.1338934, %v1873_v1 }
 0x18d   : > { %1144 = vst.msk [vmem:[%s2694_s24 + $0x30] sm:$0xff] %vm1137_vm1, %v1135_v56  ;;  %1992 = vst.msk [vmem:[%s2700_s27 + $0x30] sm:$0xff] %vm1137_vm1, %v1984_v6 }
 0x18e PF: > { %s14_s14 = sadd.s32 1, %s2332_s14   ;;  %s3171_s12 = smov %s2328_s13 }
 0x18f   : > { %p11_p5 = scmp.ge.s32.totalorder %s14_s14, 4   ;;  %s3172_s13 = smov %s3174_s15 }
 0x191   :  { %13 = sbr.rel (!%p11_p5) target bundleno = 2 (0x2), region = 70 }

</bundles_post_ra>
